<compile_context>
chip_gen: v5e
topology: v5e:2x2
jax: 0.10.0
libtpu: 0.0.40
codegen_flags: <defaults>
</compile_context>

<pallas_src>
import functools

import jax
import jax.numpy as jnp
from jax import lax
from jax.experimental import pallas as pl
from jax.experimental.pallas import tpu as pltpu


_LANE = 128
_VMEM_TILE_BUDGET = 40 * 1024 * 1024   # sized for v7x (64 MiB physical VMEM)
_VMEM_LIMIT_BYTES = 48 * 1024 * 1024   # raise v5e's 16 MiB scoped default


def _round_up(x, m):
    return (x + m - 1) // m * m


def _pick_tk(d_pad, c, b, budget=_VMEM_TILE_BUDGET):
    """Largest 128-multiple K tile that divides d_pad and fits the VMEM budget."""
    # Resident bytes: f32 teacher-logit accumulator + (conservatively
    # double-buffered) grid-invariant blocks: 2 logit slabs, bias, labels.
    resident = (b * c * 4
                + 2 * (2 * b * c + c + 8 * _LANE) * 4)
    tk = _LANE
    for cand in (4096, 2048, 1024, 512, 256, 128):
        if cand > d_pad:
            continue
        # double-buffered bf16 W tile + double-buffered f32 x tile
        if 2 * cand * c * 2 + 2 * b * cand * 4 + resident <= budget:
            tk = cand
            break
    while d_pad % tk != 0:
        tk //= 2
    return max(tk, _LANE)


def prepare_teacher_params(teacher_w, teacher_b):
    """One-time teacher-weight prep: bf16 cast + zero-pad D to a 128 multiple.

    Doing this OUTSIDE the per-step forward means the only HBM traffic on the
    dominant weight stream is the kernel's own bf16 read.
    """
    d, c = teacher_w.shape
    d_pad = _round_up(d, _LANE)
    w = teacher_w.astype(jnp.bfloat16)
    if d_pad != d:
        w = jnp.pad(w, ((0, d_pad - d), (0, 0)))   # zero rows contribute 0
    b = teacher_b.reshape(1, c).astype(jnp.float32)
    return w, b


# ---------------------- fused teacher-matmul + loss kernel ------------------ #
def _fused_distill_kernel(x_ref, w_ref, b_ref, out_ref, kd_ref, labels_ref,
                          loss_ref, tacc_ref, *, alpha, tau, distill_type):
    k = pl.program_id(0)
    nk = pl.num_programs(0)

    @pl.when(k == 0)
    def _():
        tacc_ref[...] = jnp.zeros_like(tacc_ref)

    # Teacher matmul partial product: bf16 x bf16 -> f32 accumulate on the MXU.
    # The x tile is cast on the VPU so the x HBM stream stays as-is.
    tacc_ref[...] += jnp.dot(x_ref[...].astype(jnp.bfloat16), w_ref[...],
                             preferred_element_type=jnp.float32)

    @pl.when(k == nk - 1)
    def _():
        teach = tacc_ref[...] + b_ref[...]                       # teacher logits
        logits = out_ref[...].astype(jnp.float32)                # class token
        kd = kd_ref[...].astype(jnp.float32)                     # dist token
        B, C = logits.shape

        def softmax_parts(x):
            m = jnp.max(x, axis=1, keepdims=True)
            s = x - m
            e = jnp.exp(s)
            z = jnp.sum(e, axis=1, keepdims=True)
            return s, e, z

        class_iota = lax.broadcasted_iota(jnp.int32, (B, C), 1)

        # base criterion: CrossEntropyLoss(outputs, labels), mean over batch.
        onehot = (class_iota == labels_ref[...]).astype(jnp.float32)
        s_o, _, z_o = softmax_parts(logits)
        base_loss = -jnp.sum(onehot * (s_o - jnp.log(z_o))) / B

        if distill_type == "soft":
            T = tau
            s_s, _, z_s = softmax_parts(kd * (1.0 / T))
            ls_s = s_s - jnp.log(z_s)
            s_t, e_t, z_t = softmax_parts(teach * (1.0 / T))
            ls_t = s_t - jnp.log(z_t)
            p_t = e_t / z_t          # exact softmax of the teacher
            # F.kl_div(ls_s, ls_t, reduction='sum', log_target=True) * T^2 / numel
            kl = jnp.sum(p_t * (ls_t - ls_s))
            distill_loss = kl * (T * T) / (B * C)
        else:  # 'hard': CE(outputs_kd, argmax(teacher)), first-max tie-breaking.
            max_t = jnp.max(teach, axis=1, keepdims=True)
            first_max_idx = jnp.min(
                jnp.where(teach == max_t, class_iota, C), axis=1, keepdims=True)
            onehot_t = (class_iota == first_max_idx).astype(jnp.float32)
            s_k, _, z_k = softmax_parts(kd)
            distill_loss = -jnp.sum(onehot_t * (s_k - jnp.log(z_k))) / B

        loss_ref[0, 0] = base_loss * (1.0 - alpha) + distill_loss * alpha


# ------------------------ CE-only kernel (type == 'none') ------------------- #
def _ce_kernel(out_ref, labels_ref, loss_ref):
    logits = out_ref[...].astype(jnp.float32)
    B, C = logits.shape
    class_iota = lax.broadcasted_iota(jnp.int32, (B, C), 1)
    onehot = (class_iota == labels_ref[...]).astype(jnp.float32)
    m = jnp.max(logits, axis=1, keepdims=True)
    s = logits - m
    lse = jnp.log(jnp.sum(jnp.exp(s), axis=1, keepdims=True))
    loss_ref[0, 0] = -jnp.sum(onehot * (s - lse)) / B


# ------------------------------- full forward ------------------------------- #
def distillation_loss_forward(inputs, outputs, outputs_kd, labels,
                              teacher_w_bf16, teacher_b_f32,
                              *, alpha, tau, distillation_type):
    assert distillation_type in ("none", "soft", "hard")
    B, C = outputs.shape
    labels2d = labels.reshape(B, 1).astype(jnp.int32)
    # TODO(synk): labels could move to SMEM via scalar prefetch (lowest priority).

    if distillation_type == "none":
        # Teacher is never evaluated (matches the PyTorch early return).
        loss = pl.pallas_call(
            _ce_kernel,
            out_shape=jax.ShapeDtypeStruct((1, 1), jnp.float32),
            grid=(1,),
            in_specs=[pl.BlockSpec((B, C), lambda i: (0, 0)),
                      pl.BlockSpec((B, 1), lambda i: (0, 0))],
            out_specs=pl.BlockSpec(memory_space=pltpu.MemorySpace.SMEM),
        )(outputs, labels2d)
        return loss[0, 0]

    # glue: flatten NCHW inputs row-major -> [B, D]; pad D to the prepared width.
    x_flat = inputs.reshape(B, -1)
    D = x_flat.shape[1]
    D_pad, C_w = teacher_w_bf16.shape
    assert C_w == C and D_pad >= D and D_pad % _LANE == 0
    if D_pad != D:
        x_flat = jnp.pad(x_flat, ((0, 0), (0, D_pad - D)))   # tiny vs. W stream

    tk = _pick_tk(D_pad, C, B)
    nk = D_pad // tk

    kern = functools.partial(
        _fused_distill_kernel,
        alpha=float(alpha), tau=float(tau), distill_type=distillation_type,
    )
    cost = pl.CostEstimate(
        flops=2 * B * D_pad * C + 30 * B * C,
        transcendentals=3 * B * C,
        bytes_accessed=B * D_pad * 4 + D_pad * C * 2 + (3 * B * C + C + B) * 4 + 4,
    )

    loss = pl.pallas_call(
        kern,
        out_shape=jax.ShapeDtypeStruct((1, 1), jnp.float32),
        grid_spec=pltpu.PrefetchScalarGridSpec(
            num_scalar_prefetch=0,
            grid=(nk,),
            in_specs=[
                pl.BlockSpec((B, tk), lambda k: (0, k)),   # x_flat (f32, cast in-kernel)
                pl.BlockSpec((tk, C), lambda k: (k, 0)),   # teacher_w (bf16), streamed over K
                pl.BlockSpec((1, C), lambda k: (0, 0)),    # teacher_b (grid-invariant)
                pl.BlockSpec((B, C), lambda k: (0, 0)),    # student class-token logits
                pl.BlockSpec((B, C), lambda k: (0, 0)),    # student dist-token logits
                pl.BlockSpec((B, 1), lambda k: (0, 0)),    # labels
            ],
            out_specs=pl.BlockSpec(memory_space=pltpu.MemorySpace.SMEM),
            scratch_shapes=[pltpu.VMEM((B, C), jnp.float32)],  # teacher-logit acc
        ),
        compiler_params=pltpu.CompilerParams(
            dimension_semantics=("arbitrary",),
            vmem_limit_bytes=_VMEM_LIMIT_BYTES),
        cost_estimate=cost,
    )(x_flat, teacher_w_bf16, teacher_b_f32, outputs, outputs_kd, labels2d)
    return loss[0, 0]


# --------------------------------- reference -------------------------------- #
def _reference(inputs, outputs, outputs_kd, labels, teacher_w, teacher_b,
               alpha, tau, distillation_type):
    B = inputs.shape[0]
    # Same bf16 teacher semantics as the kernel (f32 accumulation).
    x_bf = inputs.reshape(B, -1).astype(jnp.bfloat16)
    teach = jnp.dot(x_bf, teacher_w.astype(jnp.bfloat16),
                    preferred_element_type=jnp.float32) + teacher_b
    outs = outputs.astype(jnp.float32)
    kd = outputs_kd.astype(jnp.float32)
    base = jnp.mean(-jax.nn.log_softmax(outs, axis=1)[jnp.arange(B), labels])
    if distillation_type == "none":
        return base
    if distillation_type == "soft":
        T = tau
        ls_s = jax.nn.log_softmax(kd / T, axis=1)
        ls_t = jax.nn.log_softmax(teach / T, axis=1)
        kl = jnp.sum(jnp.exp(ls_t) * (ls_t - ls_s))
        dist = kl * (T * T) / kd.size
    else:
        t_idx = jnp.argmax(teach, axis=1)
        dist = jnp.mean(-jax.nn.log_softmax(kd, axis=1)[jnp.arange(B), t_idx])
    return base * (1.0 - alpha) + dist * alpha


if __name__ == "__main__":
    B, CIN, H, W = 8, 4, 16, 16
    NUM_CLASSES = 128
    D = CIN * H * W
    ALPHA, TAU = 0.5, 2.0

    key = jax.random.PRNGKey(0)
    k_in, k_out, k_kd, k_lab, k_w, k_b = jax.random.split(key, 6)

    inputs = jax.random.normal(k_in, (B, CIN, H, W), jnp.float32)        # NCHW
    outputs = jax.random.normal(k_out, (B, NUM_CLASSES), jnp.float32)    # class token
    outputs_kd = jax.random.normal(k_kd, (B, NUM_CLASSES), jnp.float32)  # dist token
    labels = jax.random.randint(k_lab, (B,), 0, NUM_CLASSES, jnp.int32)

    # deterministic synthetic teacher parameters
    teacher_w = 0.02 * jax.random.normal(k_w, (D, NUM_CLASSES), jnp.float32)
    teacher_b = 0.01 * jax.random.normal(k_b, (NUM_CLASSES,), jnp.float32)

    # One-time teacher prep (bf16 + padded D) — done OUTSIDE the forward, so no
    # per-call cast traffic on the dominant weight stream.
    w_bf, b_f32 = prepare_teacher_params(teacher_w, teacher_b)
    w_bf, b_f32 = jax.block_until_ready((w_bf, b_f32))

    fwd = jax.jit(distillation_loss_forward,
                  static_argnames=("alpha", "tau", "distillation_type"))

    ok = True
    for dtype_ in ("soft", "hard", "none"):
        loss = fwd(inputs, outputs, outputs_kd, labels, w_bf, b_f32,
                   alpha=ALPHA, tau=TAU, distillation_type=dtype_)
        loss = jax.block_until_ready(loss)
        ref = _reference(inputs, outputs, outputs_kd, labels,
                         teacher_w, teacher_b, ALPHA, TAU, dtype_)
        ok &= bool(jnp.isfinite(loss))
        ok &= bool(jnp.allclose(loss, ref, rtol=5e-3, atol=5e-3))
        assert ok, (dtype_, float(loss), float(ref))

    # TODO(synk): teacher_model / base_criterion are arbitrary nn.Modules in the
    # original; here they are a synthetic linear teacher + cross-entropy.
    print("KERNEL_OK")
</pallas_src>

<mosaic_0001>
module attributes {stable_mosaic.version = 11 : i64} {
  func.func @_fused_distill_kernel(%arg0: i32, %arg1: memref<8x1024xf32, #tpu.memory_space<vmem>>, %arg2: memref<1024x128xbf16, #tpu.memory_space<vmem>>, %arg3: memref<1x128xf32, #tpu.memory_space<vmem>>, %arg4: memref<8x128xf32, #tpu.memory_space<vmem>>, %arg5: memref<8x128xf32, #tpu.memory_space<vmem>>, %arg6: memref<8x1xi32, #tpu.memory_space<vmem>>, %arg7: memref<1x1xf32, #tpu.memory_space<smem>>, %arg8: memref<8x128xf32, #tpu.memory_space<vmem>>) attributes {dimension_semantics = [#tpu.dimension_semantics<arbitrary>], iteration_bounds = array<i64: 1>, scalar_prefetch = 0 : i64, scratch_operands = 1 : i64, tpu.core_type = #tpu.core_type<tc>, window_params = [{transform_indices = @transform_0, window_bounds = array<i64: 8, 1024>}, {transform_indices = @transform_1, window_bounds = array<i64: 1024, 128>}, {pipeline_mode = #tpu.pipeline_mode<synchronous>, transform_indices = @transform_2, window_bounds = array<i64: 1, 128>}, {pipeline_mode = #tpu.pipeline_mode<synchronous>, transform_indices = @transform_3, window_bounds = array<i64: 8, 128>}, {pipeline_mode = #tpu.pipeline_mode<synchronous>, transform_indices = @transform_4, window_bounds = array<i64: 8, 128>}, {pipeline_mode = #tpu.pipeline_mode<synchronous>, transform_indices = @transform_5, window_bounds = array<i64: 8, 1>}, {transform_indices = @transform_6, window_bounds = array<i64: 1, 1>}]} {
    %c0_i32 = arith.constant 0 : i32
    %0 = arith.cmpi eq, %arg0, %c0_i32 : i32
    %1 = arith.extui %0 : i1 to i32
    %c0_i32_0 = arith.constant 0 : i32
    %2 = arith.cmpi ne, %1, %c0_i32_0 : i32
    scf.if %2 {
      %cst_10 = arith.constant 0.000000e+00 : f32
      %13 = vector.broadcast %cst_10 : f32 to vector<8x128xf32>
      %c0_11 = arith.constant 0 : index
      %c0_12 = arith.constant 0 : index
      %14 = vector.load %arg8[%c0_11, %c0_12] : memref<8x128xf32, #tpu.memory_space<vmem>>, vector<8x128xf32>
      tpu.vector_store %arg8[%c0_11, %c0_12], %13 {strides = array<i32>} : memref<8x128xf32, #tpu.memory_space<vmem>>, vector<8x128xf32>,
    } else {
    }
    %c0 = arith.constant 0 : index
    %c0_1 = arith.constant 0 : index
    %3 = vector.load %arg8[%c0, %c0_1] : memref<8x128xf32, #tpu.memory_space<vmem>>, vector<8x128xf32>
    %c0_2 = arith.constant 0 : index
    %c0_3 = arith.constant 0 : index
    %4 = vector.load %arg1[%c0_2, %c0_3] : memref<8x1024xf32, #tpu.memory_space<vmem>>, vector<8x1024xf32>
    %5 = arith.truncf %4 : vector<8x1024xf32> to vector<8x1024xbf16>
    %c0_4 = arith.constant 0 : index
    %c0_5 = arith.constant 0 : index
    %6 = vector.load %arg2[%c0_4, %c0_5] : memref<1024x128xbf16, #tpu.memory_space<vmem>>, vector<1024x128xbf16>
    %cst = arith.constant dense<0.000000e+00> : vector<8x128xf32>
    %7 = tpu.matmul %5, %6, %cst {dimension_numbers = #tpu.dot_dimension_numbers<[1], [0], [0], [1], [0, 0, 1, 1], [], []>} : vector<8x1024xbf16>, vector<1024x128xbf16>, vector<8x128xf32> -> vector<8x128xf32>
    %8 = arith.addf %3, %7 : vector<8x128xf32>
    %c0_6 = arith.constant 0 : index
    %c0_7 = arith.constant 0 : index
    %9 = vector.load %arg8[%c0_6, %c0_7] : memref<8x128xf32, #tpu.memory_space<vmem>>, vector<8x128xf32>
    tpu.vector_store %arg8[%c0_6, %c0_7], %8 {strides = array<i32>} : memref<8x128xf32, #tpu.memory_space<vmem>>, vector<8x128xf32>,
    %c0_i32_8 = arith.constant 0 : i32
    %10 = arith.cmpi eq, %arg0, %c0_i32_8 : i32
    %11 = arith.extui %10 : i1 to i32
    %c0_i32_9 = arith.constant 0 : i32
    %12 = arith.cmpi ne, %11, %c0_i32_9 : i32
    scf.if %12 {
      %c0_10 = arith.constant 0 : index
      %c0_11 = arith.constant 0 : index
      %13 = vector.load %arg8[%c0_10, %c0_11] : memref<8x128xf32, #tpu.memory_space<vmem>>, vector<8x128xf32>
      %c0_12 = arith.constant 0 : index
      %c0_13 = arith.constant 0 : index
      %14 = vector.load %arg3[%c0_12, %c0_13] : memref<1x128xf32, #tpu.memory_space<vmem>>, vector<1x128xf32>
      %15 = vector.broadcast %14 : vector<1x128xf32> to vector<8x128xf32>
      %16 = arith.addf %13, %15 : vector<8x128xf32>
      %c0_14 = arith.constant 0 : index
      %c0_15 = arith.constant 0 : index
      %17 = vector.load %arg4[%c0_14, %c0_15] : memref<8x128xf32, #tpu.memory_space<vmem>>, vector<8x128xf32>
      %c0_16 = arith.constant 0 : index
      %c0_17 = arith.constant 0 : index
      %18 = vector.load %arg5[%c0_16, %c0_17] : memref<8x128xf32, #tpu.memory_space<vmem>>, vector<8x128xf32>
      %19 = tpu.iota {dimensions = array<i32: 1>} : vector<8x128xi32>
      %c0_18 = arith.constant 0 : index
      %c0_19 = arith.constant 0 : index
      %20 = vector.load %arg6[%c0_18, %c0_19] : memref<8x1xi32, #tpu.memory_space<vmem>>, vector<8x1xi32>
      %21 = vector.broadcast %20 : vector<8x1xi32> to vector<8x128xi32>
      %22 = arith.cmpi eq, %19, %21 : vector<8x128xi32>
      %23 = arith.extui %22 : vector<8x128xi1> to vector<8x128xi32>
      %24 = arith.sitofp %23 : vector<8x128xi32> to vector<8x128xf32>
      %cst_20 = arith.constant dense<0xFF800000> : vector<8xf32>
      %25 = vector.multi_reduction <maximumf>, %17, %cst_20 [1] : vector<8x128xf32> to vector<8xf32>
      %26 = vector.shape_cast %25 : vector<8xf32> to vector<8x1xf32>
      %27 = vector.broadcast %26 : vector<8x1xf32> to vector<8x128xf32>
      %28 = arith.subf %17, %27 : vector<8x128xf32>
      %29 = math.exp %28 : vector<8x128xf32>
      %cst_21 = arith.constant dense<0.000000e+00> : vector<8xf32>
      %30 = vector.multi_reduction <add>, %29, %cst_21 [1] : vector<8x128xf32> to vector<8xf32>
      %31 = vector.shape_cast %30 : vector<8xf32> to vector<8x1xf32>
      %32 = math.log %31 : vector<8x1xf32>
      %33 = vector.broadcast %32 : vector<8x1xf32> to vector<8x128xf32>
      %34 = arith.subf %28, %33 : vector<8x128xf32>
      %35 = arith.mulf %24, %34 : vector<8x128xf32>
      %36 = vector.shape_cast %35 : vector<8x128xf32> to vector<1x8x128xf32>
      %cst_22 = arith.constant dense<0.000000e+00> : vector<1xf32>
      %37 = vector.multi_reduction <add>, %36, %cst_22 [1, 2] : vector<1x8x128xf32> to vector<1xf32>
      %38 = vector.shape_cast %37 : vector<1xf32> to vector<1x1x1xf32>
      %39 = vector.extract %38[0, 0, 0] : f32 from vector<1x1x1xf32>
      %cst_23 = arith.constant 0.000000e+00 : f32
      %40 = arith.subf %cst_23, %39 : f32
      %cst_24 = arith.constant 8.000000e+00 : f32
      %41 = arith.divf %40, %cst_24 : f32
      %cst_25 = arith.constant 5.000000e-01 : f32
      %42 = vector.broadcast %cst_25 : f32 to vector<8x128xf32>
      %43 = arith.mulf %18, %42 : vector<8x128xf32>
      %cst_26 = arith.constant dense<0xFF800000> : vector<8xf32>
      %44 = vector.multi_reduction <maximumf>, %43, %cst_26 [1] : vector<8x128xf32> to vector<8xf32>
      %45 = vector.shape_cast %44 : vector<8xf32> to vector<8x1xf32>
      %46 = vector.broadcast %45 : vector<8x1xf32> to vector<8x128xf32>
      %47 = arith.subf %43, %46 : vector<8x128xf32>
      %48 = math.exp %47 : vector<8x128xf32>
      %cst_27 = arith.constant dense<0.000000e+00> : vector<8xf32>
      %49 = vector.multi_reduction <add>, %48, %cst_27 [1] : vector<8x128xf32> to vector<8xf32>
      %50 = vector.shape_cast %49 : vector<8xf32> to vector<8x1xf32>
      %51 = math.log %50 : vector<8x1xf32>
      %52 = vector.broadcast %51 : vector<8x1xf32> to vector<8x128xf32>
      %53 = arith.subf %47, %52 : vector<8x128xf32>
      %cst_28 = arith.constant 5.000000e-01 : f32
      %54 = vector.broadcast %cst_28 : f32 to vector<8x128xf32>
      %55 = arith.mulf %16, %54 : vector<8x128xf32>
      %cst_29 = arith.constant dense<0xFF800000> : vector<8xf32>
      %56 = vector.multi_reduction <maximumf>, %55, %cst_29 [1] : vector<8x128xf32> to vector<8xf32>
      %57 = vector.shape_cast %56 : vector<8xf32> to vector<8x1xf32>
      %58 = vector.broadcast %57 : vector<8x1xf32> to vector<8x128xf32>
      %59 = arith.subf %55, %58 : vector<8x128xf32>
      %60 = math.exp %59 : vector<8x128xf32>
      %cst_30 = arith.constant dense<0.000000e+00> : vector<8xf32>
      %61 = vector.multi_reduction <add>, %60, %cst_30 [1] : vector<8x128xf32> to vector<8xf32>
      %62 = vector.shape_cast %61 : vector<8xf32> to vector<8x1xf32>
      %63 = math.log %62 : vector<8x1xf32>
      %64 = vector.broadcast %63 : vector<8x1xf32> to vector<8x128xf32>
      %65 = arith.subf %59, %64 : vector<8x128xf32>
      %66 = vector.broadcast %62 : vector<8x1xf32> to vector<8x128xf32>
      %67 = arith.divf %60, %66 : vector<8x128xf32>
      %68 = arith.subf %65, %53 : vector<8x128xf32>
      %69 = arith.mulf %67, %68 : vector<8x128xf32>
      %70 = vector.shape_cast %69 : vector<8x128xf32> to vector<1x8x128xf32>
      %cst_31 = arith.constant dense<0.000000e+00> : vector<1xf32>
      %71 = vector.multi_reduction <add>, %70, %cst_31 [1, 2] : vector<1x8x128xf32> to vector<1xf32>
      %72 = vector.shape_cast %71 : vector<1xf32> to vector<1x1x1xf32>
      %73 = vector.extract %72[0, 0, 0] : f32 from vector<1x1x1xf32>
      %cst_32 = arith.constant 4.000000e+00 : f32
      %74 = arith.mulf %73, %cst_32 : f32
      %cst_33 = arith.constant 1.024000e+03 : f32
      %75 = arith.divf %74, %cst_33 : f32
      %cst_34 = arith.constant 5.000000e-01 : f32
      %76 = arith.mulf %41, %cst_34 : f32
      %cst_35 = arith.constant 5.000000e-01 : f32
      %77 = arith.mulf %75, %cst_35 : f32
      %78 = arith.addf %76, %77 : f32
      %c0_36 = arith.constant 0 : index
      %c0_37 = arith.constant 0 : index
      %79 = memref.load %arg7[%c0_36, %c0_37] : memref<1x1xf32, #tpu.memory_space<smem>>
      memref.store %78, %arg7[%c0_36, %c0_37] : memref<1x1xf32, #tpu.memory_space<smem>>
    } else {
    }
    return
  }
  func.func @transform_0(%arg0: i32) -> (i32, i32) {
    %c0_i32 = arith.constant 0 : i32
    %c0_i32_0 = arith.constant 0 : i32
    return %c0_i32, %arg0 : i32, i32
  }
  func.func @transform_1(%arg0: i32) -> (i32, i32) {
    %c0_i32 = arith.constant 0 : i32
    %c0_i32_0 = arith.constant 0 : i32
    return %arg0, %c0_i32 : i32, i32
  }
  func.func @transform_2(%arg0: i32) -> (i32, i32) {
    %c0_i32 = arith.constant 0 : i32
    %c0_i32_0 = arith.constant 0 : i32
    %c0_i32_1 = arith.constant 0 : i32
    return %c0_i32, %c0_i32_0 : i32, i32
  }
  func.func @transform_3(%arg0: i32) -> (i32, i32) {
    %c0_i32 = arith.constant 0 : i32
    %c0_i32_0 = arith.constant 0 : i32
    %c0_i32_1 = arith.constant 0 : i32
    return %c0_i32, %c0_i32_0 : i32, i32
  }
  func.func @transform_4(%arg0: i32) -> (i32, i32) {
    %c0_i32 = arith.constant 0 : i32
    %c0_i32_0 = arith.constant 0 : i32
    %c0_i32_1 = arith.constant 0 : i32
    return %c0_i32, %c0_i32_0 : i32, i32
  }
  func.func @transform_5(%arg0: i32) -> (i32, i32) {
    %c0_i32 = arith.constant 0 : i32
    %c0_i32_0 = arith.constant 0 : i32
    %c0_i32_1 = arith.constant 0 : i32
    return %c0_i32, %c0_i32_0 : i32, i32
  }
  func.func @transform_6(%arg0: i32) -> (i32, i32) {
    %c0_i32 = arith.constant 0 : i32
    %c0_i32_0 = arith.constant 0 : i32
    %c0_i32_1 = arith.constant 0 : i32
    return %c0_i32, %c0_i32_0 : i32, i32
  }
}

</mosaic_0001>

<bundles_post_ra>
// kernel: distillation_loss_forward.1
= control target key start
LH: loop header
LB: loop body
LE: loop exit
PB: predicated region body
PF: predicated region fallthrough
CT: control target
= control target key end

     0   :  { %s1431_s0 = inlined_call_operand.vmem [shape: f32[8,1024], index: 0, kind: input, shape index: {}]   ;;  %s1432_s1 = inlined_call_operand.vmem [shape: bf16[1024,128], index: 1, kind: input, shape index: {}]   ;;  %s1433_s2 = inlined_call_operand.vmem [shape: f32[1,128], index: 2, kind: input, shape index: {}]   ;;  %s1434_s3 = inlined_call_operand.vmem [shape: f32[8,128], index: 3, kind: input, shape index: {}]   ;;  %s1435_s4 = inlined_call_operand.vmem [shape: f32[8,128], index: 4, kind: input, shape index: {}]   ;;  %s1436_s5 = inlined_call_operand.vmem [shape: s32[8,1], index: 5, kind: input, shape index: {}]   ;;  %s1437_s6 = inlined_call_operand.hbm [shape: f32[1,1], index: 6, kind: output, shape index: {}]  }
   0x1   :  { %v1056_v0 = vld [vmem:[%s1432_s1 + $0x38] sm:$0xff]  ;;  %v1055_v4 = vld [vmem:[%s1432_s1 + $0x30] sm:$0xff]  ;;  %v1054_v8 = vld [vmem:[%s1432_s1 + $0x28] sm:$0xff] }
   0x2   :  { %v1064_v1 = vld [vmem:[%s1432_s1 + $0x78] sm:$0xff]  ;;  %558 = vmatpush.bf16.msra.mxu0 %v1056_v0  ;;  %v1063_v5 = vld [vmem:[%s1432_s1 + $0x70] sm:$0xff]  ;;  %v1062_v9 = vld [vmem:[%s1432_s1 + $0x68] sm:$0xff] }
   0x3   :  { %v1072_v2 = vld [vmem:[%s1432_s1 + $0xb8] sm:$0xff]  ;;  %571 = vmatpush.bf16.msra.mxu1 %v1064_v1  ;;  %v1071_v6 = vld [vmem:[%s1432_s1 + $0xb0] sm:$0xff]  ;;  %v1070_v10 = vld [vmem:[%s1432_s1 + $0xa8] sm:$0xff] }
   0x4   :  { %v1080_v3 = vld [vmem:[%s1432_s1 + $0xf8] sm:$0xff]  ;;  %584 = vmatpush.bf16.msra.mxu2 %v1072_v2  ;;  %v1079_v7 = vld [vmem:[%s1432_s1 + $0xf0] sm:$0xff]  ;;  %v1078_v11 = vld [vmem:[%s1432_s1 + $0xe8] sm:$0xff] }
   0x5   :  { %597 = vmatpush.bf16.msra.mxu3 %v1080_v3  ;;  %v1053_v12 = vld [vmem:[%s1432_s1 + $0x20] sm:$0xff]  ;;  %v1052_v16 = vld [vmem:[%s1432_s1 + $0x18] sm:$0xff]  ;;  %v1051_v20 = vld [vmem:[%s1432_s1 + $0x10] sm:$0xff] }
   0x6   :  { %559 = vmatpush.bf16.msra.mxu0 %v1055_v4  ;;  %v1061_v13 = vld [vmem:[%s1432_s1 + $0x60] sm:$0xff]  ;;  %v1060_v17 = vld [vmem:[%s1432_s1 + $0x58] sm:$0xff]  ;;  %v1059_v21 = vld [vmem:[%s1432_s1 + $0x50] sm:$0xff] }
   0x7   :  { %572 = vmatpush.bf16.msra.mxu1 %v1063_v5  ;;  %v1069_v14 = vld [vmem:[%s1432_s1 + $0xa0] sm:$0xff]  ;;  %v1068_v18 = vld [vmem:[%s1432_s1 + $0x98] sm:$0xff]  ;;  %v1067_v22 = vld [vmem:[%s1432_s1 + $0x90] sm:$0xff] }
   0x8   :  { %585 = vmatpush.bf16.msra.mxu2 %v1071_v6  ;;  %v1077_v15 = vld [vmem:[%s1432_s1 + $0xe0] sm:$0xff]  ;;  %v1076_v19 = vld [vmem:[%s1432_s1 + $0xd8] sm:$0xff]  ;;  %v1075_v23 = vld [vmem:[%s1432_s1 + $0xd0] sm:$0xff] }
   0x9   :  { %598 = vmatpush.bf16.msra.mxu3 %v1079_v7 }
   0xa   :  { %560 = vmatpush.bf16.msra.mxu0 %v1054_v8 }
   0xb   :  { %573 = vmatpush.bf16.msra.mxu1 %v1062_v9 }
   0xc   :  { %586 = vmatpush.bf16.msra.mxu2 %v1070_v10 }
   0xd   :  { %599 = vmatpush.bf16.msra.mxu3 %v1078_v11 }
   0xe   :  { %561 = vmatpush.bf16.msra.mxu0 %v1053_v12 }
   0xf   :  { %574 = vmatpush.bf16.msra.mxu1 %v1061_v13 }
  0x10   :  { %587 = vmatpush.bf16.msra.mxu2 %v1069_v14 }
  0x11   :  { %600 = vmatpush.bf16.msra.mxu3 %v1077_v15 }
  0x12   :  { %562 = vmatpush.bf16.msra.mxu0 %v1052_v16 }
  0x13   :  { %575 = vmatpush.bf16.msra.mxu1 %v1060_v17 }
  0x14   :  { %588 = vmatpush.bf16.msra.mxu2 %v1068_v18 }
  0x15   :  { %601 = vmatpush.bf16.msra.mxu3 %v1076_v19 }
  0x16   :  { %11 = vsyncpa [#allocation4], 0  ;;  %563 = vmatpush.bf16.msra.mxu0 %v1051_v20  ;;  %v1050_v24 = vld [vmem:[%s1432_s1 + $0x8] sm:$0xff]  ;;  %v1049_v28 = vld [vmem:[%s1432_s1] sm:$0xff]  ;;  %s782_s10 = sshll.u32 %s1437_s6, 4  ;;  %s1164_s13 = smov [#allocation3]   ;;  %s783_s10 = int_to_ptr.hbm [resolvable:$true] %s782_s10 }
  0x17   :  { %576 = vmatpush.bf16.msra.mxu1 %v1059_v21  ;;  %v1058_v25 = vld [vmem:[%s1432_s1 + $0x48] sm:$0xff]  ;;  %v1057_v29 = vld [vmem:[%s1432_s1 + $0x40] sm:$0xff]  ;;  %v1088_v32 = vld [vmem:[%s1432_s1 + $0x138] sm:$0xff] }
  0x18   :  { %589 = vmatpush.bf16.msra.mxu2 %v1067_v22  ;;  %v1066_v26 = vld [vmem:[%s1432_s1 + $0x88] sm:$0xff]  ;;  %v1065_v30 = vld [vmem:[%s1432_s1 + $0x80] sm:$0xff]  ;;  %v32_v33 = vld [vmem:[%s1431_s0 + $0x10] sm:$0xff] }
  0x19   :  { %602 = vmatpush.bf16.msra.mxu3 %v1075_v23  ;;  %v1074_v27 = vld [vmem:[%s1432_s1 + $0xc8] sm:$0xff]  ;;  %v1073_v31 = vld [vmem:[%s1432_s1 + $0xc0] sm:$0xff]  ;;  %v1096_v35 = vld [vmem:[%s1432_s1 + $0x178] sm:$0xff]  ;;  %v40_v40 = vpack.c.bf16 %v32_v33, %v32_v33 }
  0x1a   :  { %564 = vmatpush.bf16.msra.mxu0 %v1050_v24  ;;  %v30_v34 = vld [vmem:[%s1431_s0] sm:$0xff]  ;;  %v33_v36 = vld [vmem:[%s1431_s0 + $0x18] sm:$0xff]  ;;  %v31_v37 = vld [vmem:[%s1431_s0 + $0x8] sm:$0xff] }
  0x1b   :  { %577 = vmatpush.bf16.msra.mxu1 %v1058_v25  ;;  %v1104_v38 = vld [vmem:[%s1432_s1 + $0x1b8] sm:$0xff]  ;;  %v38_v41 = vpack.c.bf16 %v30_v34, %v30_v34  ;;  %v41_v42 = vpack.c.bf16 %v33_v36, %v33_v36  ;;  %v39_v43 = vpack.c.bf16 %v31_v37, %v31_v37  ;;  %v1087_v44 = vld [vmem:[%s1432_s1 + $0x130] sm:$0xff]  ;;  %v1086_v48 = vld [vmem:[%s1432_s1 + $0x128] sm:$0xff] }
  0x1c   :  { %590 = vmatpush.bf16.msra.mxu2 %v1066_v26  ;;  %v1112_v39 = vld [vmem:[%s1432_s1 + $0x1f8] sm:$0xff]  ;;  %v1095_v45 = vld [vmem:[%s1432_s1 + $0x170] sm:$0xff]  ;;  %v1094_v49 = vld [vmem:[%s1432_s1 + $0x168] sm:$0xff] }
  0x1d   :  { %603 = vmatpush.bf16.msra.mxu3 %v1074_v27  ;;  %v1103_v46 = vld [vmem:[%s1432_s1 + $0x1b0] sm:$0xff]  ;;  %v1102_v50 = vld [vmem:[%s1432_s1 + $0x1a8] sm:$0xff]  ;;  %v1085_v52 = vld [vmem:[%s1432_s1 + $0x120] sm:$0xff] }
  0x1e   :  { %565 = vmatpush.bf16.msra.mxu0 %v1049_v28  ;;  %v1111_v47 = vld [vmem:[%s1432_s1 + $0x1f0] sm:$0xff]  ;;  %v1110_v51 = vld [vmem:[%s1432_s1 + $0x1e8] sm:$0xff]  ;;  %v1093_v53 = vld [vmem:[%s1432_s1 + $0x160] sm:$0xff] }
  0x1f   :  { %578 = vmatpush.bf16.msra.mxu1 %v1057_v29  ;;  %v1101_v54 = vld [vmem:[%s1432_s1 + $0x1a0] sm:$0xff]  ;;  %v1084_v56 = vld [vmem:[%s1432_s1 + $0x118] sm:$0xff]  ;;  %v1083_v60 = vld [vmem:[%s1432_s1 + $0x110] sm:$0xff] }
  0x20   :  { %591 = vmatpush.bf16.msra.mxu2 %v1065_v30  ;;  %v1109_v55 = vld [vmem:[%s1432_s1 + $0x1e0] sm:$0xff]  ;;  %v1092_v57 = vld [vmem:[%s1432_s1 + $0x158] sm:$0xff]  ;;  %v1091_v61 = vld [vmem:[%s1432_s1 + $0x150] sm:$0xff] }
  0x21   :  { %604 = vmatpush.bf16.msra.mxu3 %v1073_v31  ;;  %566 = vmatmul.bf16.vlgmr.msra.gmra.mxu0 %v38_v41  ;;  %v1100_v58 = vld [vmem:[%s1432_s1 + $0x198] sm:$0xff]  ;;  %v1099_v62 = vld [vmem:[%s1432_s1 + $0x190] sm:$0xff]  ;;  %v1082_v0 = vld [vmem:[%s1432_s1 + $0x108] sm:$0xff] }
  0x22   :  { %610 = vmatpush.bf16.msrb.mxu0 %v1088_v32  ;;  %579 = vmatmul.bf16.vlgmr.msra.gmra.mxu1 %v39_v43  ;;  %v1108_v59 = vld [vmem:[%s1432_s1 + $0x1d8] sm:$0xff]  ;;  %v1107_v63 = vld [vmem:[%s1432_s1 + $0x1d0] sm:$0xff]  ;;  %v1090_v1 = vld [vmem:[%s1432_s1 + $0x148] sm:$0xff] }
  0x23   :  { %623 = vmatpush.bf16.msrb.mxu1 %v1096_v35  ;;  %592 = vmatmul.bf16.vlgmr.msra.gmra.mxu2 %v40_v40  ;;  %v1098_v2 = vld [vmem:[%s1432_s1 + $0x188] sm:$0xff]  ;;  %v1081_v4 = vld [vmem:[%s1432_s1 + $0x100] sm:$0xff]  ;;  %v36_v10 = vld [vmem:[%s1431_s0 + $0x30] sm:$0xff] }
  0x24   :  { %636 = vmatpush.bf16.msrb.mxu2 %v1104_v38  ;;  %605 = vmatmul.bf16.vlgmr.msra.gmra.mxu3 %v41_v42  ;;  %v1106_v3 = vld [vmem:[%s1432_s1 + $0x1c8] sm:$0xff]  ;;  %v1089_v5 = vld [vmem:[%s1432_s1 + $0x140] sm:$0xff]  ;;  %v37_v11 = vld [vmem:[%s1431_s0 + $0x38] sm:$0xff]  ;;  %v44_v14 = vpack.c.bf16 %v36_v10, %v36_v10 }
  0x25   :  { %649 = vmatpush.bf16.msrb.mxu3 %v1112_v39  ;;  %v1097_v6 = vld [vmem:[%s1432_s1 + $0x180] sm:$0xff]  ;;  %v35_v8 = vld [vmem:[%s1431_s0 + $0x28] sm:$0xff]  ;;  %v45_v15 = vpack.c.bf16 %v37_v11, %v37_v11 }
  0x26   :  { %611 = vmatpush.bf16.msrb.mxu0 %v1087_v44  ;;  %v34_v7 = vld [vmem:[%s1431_s0 + $0x20] sm:$0xff]  ;;  %v43_v13 = vpack.c.bf16 %v35_v8, %v35_v8 }
  0x27   :  { %624 = vmatpush.bf16.msrb.mxu1 %v1095_v45  ;;  %v1105_v9 = vld [vmem:[%s1432_s1 + $0x1c0] sm:$0xff]  ;;  %v42_v12 = vpack.c.bf16 %v34_v7, %v34_v7 }
  0x28   :  { %637 = vmatpush.bf16.msrb.mxu2 %v1103_v46  ;;  %v673_v25 = vld [vmem:[%s1434_s3] sm:$0xff]  ;;  %v1160_v46 = vmov 0  }
  0x29   :  { %650 = vmatpush.bf16.msrb.mxu3 %v1111_v47  ;;  %684 = vmax.xlane.f32.xlu1 %v673_v25  ;;  %v1127_v37 = vld [vmem:[%s1433_s2] ss:$0 sm:$0xff] }
  0x2a   :  { %612 = vmatpush.bf16.msrb.mxu0 %v1086_v48  ;;  %v674_v43 = vld [vmem:[%s1435_s4] sm:$0xff]  ;;  %1126 = vset.pattern.permute.xlu0 %v1160_v46 }
  0x2b   :  { %625 = vmatpush.bf16.msrb.mxu1 %v1094_v49  ;;  %v714_v44 = vmul.f32 0.5, %v674_v43  ;;  %v677_v45 = vld [vmem:[%s1436_s5] sm:$0xff] }
  0x2c   :  { %638 = vmatpush.bf16.msrb.mxu2 %v1102_v50 }
  0x2d   :  { %651 = vmatpush.bf16.msrb.mxu3 %v1110_v51 }
  0x2e   :  { %613 = vmatpush.bf16.msrb.mxu0 %v1085_v52 }
  0x2f   :  { %626 = vmatpush.bf16.msrb.mxu1 %v1093_v53 }
  0x30   :  { %639 = vmatpush.bf16.msrb.mxu2 %v1101_v54 }
  0x31   :  { %652 = vmatpush.bf16.msrb.mxu3 %v1109_v55 }
  0x32   :  { %614 = vmatpush.bf16.msrb.mxu0 %v1084_v56 }
  0x33   :  { %627 = vmatpush.bf16.msrb.mxu1 %v1092_v57 }
  0x34   :  { %640 = vmatpush.bf16.msrb.mxu2 %v1100_v58 }
  0x35   :  { %653 = vmatpush.bf16.msrb.mxu3 %v1108_v59 }
  0x36   :  { %615 = vmatpush.bf16.msrb.mxu0 %v1083_v60 }
  0x37   :  { %628 = vmatpush.bf16.msrb.mxu1 %v1091_v61 }
  0x38   :  { %641 = vmatpush.bf16.msrb.mxu2 %v1099_v62 }
  0x39   :  { %654 = vmatpush.bf16.msrb.mxu3 %v1107_v63 }
  0x3a   :  { %616 = vmatpush.bf16.msrb.mxu0 %v1082_v0 }
  0x3b   :  { %629 = vmatpush.bf16.msrb.mxu1 %v1090_v1 }
  0x3c   :  { %642 = vmatpush.bf16.msrb.mxu2 %v1098_v2 }
  0x3d   :  { %655 = vmatpush.bf16.msrb.mxu3 %v1106_v3 }
  0x3e   :  { %617 = vmatpush.bf16.msrb.mxu0 %v1081_v4 }
  0x3f   :  { %630 = vmatpush.bf16.msrb.mxu1 %v1089_v5 }
  0x40   :  { %643 = vmatpush.bf16.msrb.mxu2 %v1097_v6  ;;  %v675_v6 = vlaneseq }
  0x41   :  { %656 = vmatpush.bf16.msrb.mxu3 %v1105_v9  ;;  %618 = vmatmul.bf16.vlgmr.msrb.gmra.mxu0 %v42_v12 }
  0x42   :  { %631 = vmatmul.bf16.vlgmr.msrb.gmra.mxu1 %v43_v13 }
  0x43   :  { %644 = vmatmul.bf16.vlgmr.msrb.gmra.mxu2 %v44_v14 }
  0x44   :  { %657 = vmatmul.bf16.vlgmr.msrb.gmra.mxu3 %v45_v15  ;;  %v676_v15 = vand.u32 127, %v675_v6 }
  0x9c   :  { %v685_v51 = vpop.xlane.xlu1 %684 }
  0x9d   :  { %v686_v54 = vsub.f32 %v673_v25, %v685_v51 }
  0x9e   :  { %v567_v16 = vpop.f32.mrf.mxu0 }
  0x9f   :  { %v580_v17 = vpop.f32.mrf.mxu1  ;;  %v687_v56 = vmul.f32 1.442695, %v686_v54 }
  0xa0   :  { %v581_v24 = vadd.f32 %v580_v17, %v567_v16 }
  0xa6   :  { %v593_v18 = vpop.f32.mrf.mxu2  ;;  %v569_v20 = vpop.f32.mrf.mxu0 }
  0xa7   :  { %v606_v19 = vpop.f32.mrf.mxu3  ;;  %v582_v21 = vpop.f32.mrf.mxu1  ;;  %v594_v26 = vadd.f32 %v593_v18, %v581_v24 }
  0xa9   :  { %v607_v27 = vadd.f32 %v606_v19, %v594_v26  ;;  %v1162_v26 = vmov 8.0  }
  0xae   :  { %v595_v22 = vpop.f32.mrf.mxu2 }
  0xaf   :  { %v608_v23 = vpop.f32.mrf.mxu3  ;;  %v1161_v22 = vmov 0.0  }
  0xbe   :  { %v619_v28 = vpop.f32.mrf.mxu0 }
  0xbf   :  { %v632_v29 = vpop.f32.mrf.mxu1  ;;  %v620_v30 = vadd.f32 %v619_v28, %v607_v27  ;;  %v1163_v27 = vmov 1024.0  }
  0xc1   :  { %v633_v31 = vadd.f32 %v632_v29, %v620_v30 }
  0xc6   :  { %v645_v32 = vpop.f32.mrf.mxu2  ;;  %v621_v35 = vpop.f32.mrf.mxu0 }
  0xc7   :  { %v658_v33 = vpop.f32.mrf.mxu3  ;;  %v646_v34 = vadd.f32 %v645_v32, %v633_v31  ;;  %v634_v36 = vpop.f32.mrf.mxu1 }
  0xc9   :  { %v659_v38 = vadd.f32 %v658_v33, %v646_v34 }
  0xcb   :  { %v672_v39 = vadd.f32 %v1127_v37, %v659_v38 }
  0xcd   :  { %v725_v40 = vmul.f32 0.5, %v672_v39 }
  0xce   :  { %v647_v41 = vpop.f32.mrf.mxu2 }
  0xcf   :  { %v660_v42 = vpop.f32.mrf.mxu3  ;;  %726 = vmax.xlane.f32.xlu0 %v725_v40 }
  0xd7   :  { %715 = vmax.xlane.f32.xlu0 %v714_v44 }
  0xeb   :  { %679 = vperm.xlu0 %1126, %v677_v45  }
 0x142   :  { %v727_v47 = vpop.xlane.xlu0 %726 }
 0x143   :  { %v728_v48 = vsub.f32 %v725_v40, %v727_v47 }
 0x145   :  { %v729_v49 = vmul.f32 1.442695, %v728_v48 }
 0x147   :  { %1128 = vpow2.f32 %v729_v49 }
 0x14a   :  { %v716_v50 = vpop.xlane.xlu0 %715 }
 0x14b   :  { %v717_v52 = vsub.f32 %v714_v44, %v716_v50 }
 0x14d   :  { %v1129_v53 = vpop.eup %1128  ;;  %v718_v55 = vmul.f32 1.442695, %v717_v52 }
 0x14e   :  { %731 = vadd.xlane.f32.xlu1 %v1129_v53 }
 0x14f   :  { %1130 = vpow2.f32 %v718_v55 }
 0x150   :  { %1132 = vpow2.f32 %v687_v56 }
 0x155   :  { %v1131_v57 = vpop.eup %1130 }
 0x156   :  { %720 = vadd.xlane.f32.xlu2 %v1131_v57  ;;  %v1133_v58 = vpop.eup %1132 }
 0x15d   :  { %v680_v16 = vpop.permute.xlu0 %679 }
 0x15e   :  { %689 = vadd.xlane.f32.xlu2 %v1133_v58  ;;  %vm681_vm4 = vcmp.eq.s32.totalorder %v676_v15, %v680_v16 }
 0x15f   :  { %v1048_v23 = vsel %vm681_vm4, 1.0, %v1161_v22 }
 0x1c1   :  { %v732_v59 = vpop.xlane.xlu1 %731 }
 0x1c2   :  { %1134 = vrcp.f32 %v732_v59  ;;  %v747_v1 = vand.u32 2147483648, %v732_v59  ;;  %v745_v3 = vand.u32 2147483647, %v732_v59  ;;  %vm741_vm1 = vweird.f32 %v732_v59 }
 0x1c3   :  { %1136 = vlog2.f32 %v732_v59 }
 0x1c4   :  { %v748_v8 = vor.u32 1.1754944e-38, %v747_v1  ;;  %vm746_vm3 = vcmp.eq.f32.partialorder %v745_v3, 8.507059e+37 }
 0x1c8   :  { %v1135_v60 = vpop.eup %1134 }
 0x1c9   :  { %v737_v61 = vmul.f32 %v1135_v60, %v732_v59  ;;  %v721_v62 = vpop.xlane.xlu2 %720  ;;  %v1137_v0 = vpop.eup %1136  ;;  %vm742_vm0 = vweird.f32 %v1135_v60 }
 0x1ca   :  { %1138 = vlog2.f32 %v721_v62  ;;  %v734_v4 = vmul.f32 0.6931472, %v1137_v0  ;;  %vm743_vm2 = vmor %vm741_vm1, %vm742_vm0 }
 0x1cb   :  { %v738_v63 = vsub.f32 1.0, %v737_v61 }
 0x1cc   :  { %v735_v14 = vsub.f32 %v728_v48, %v734_v4 }
 0x1cd   :  { %v739_v2 = vmul.f32 %v1135_v60, %v738_v63 }
 0x1cf   :  { %v740_v5 = vadd.f32 %v1135_v60, %v739_v2 }
 0x1d0   :  { %v1139_v7 = vpop.eup %1138 }
 0x1d1   :  { %v723_v9 = vmul.f32 0.6931472, %v1139_v7  ;;  %v690_v10 = vpop.xlane.xlu2 %689  ;;  %v744_v11 = vsel %vm743_vm2, %v1135_v60, %v740_v5 }
 0x1d2   :  { %1140 = vlog2.f32 %v690_v10  ;;  %v749_v12 = vsel %vm746_vm3, %v748_v8, %v744_v11 }
 0x1d3   :  { %v724_v13 = vsub.f32 %v717_v52, %v723_v9  ;;  %v750_v17 = vmul.f32 %v1129_v53, %v749_v12  ;;  %1142 = vrcp.f32 %v1162_v26 }
 0x1d4   :  { %1144 = vrcp.f32 %v1163_v27 }
 0x1d5   :  { %v751_v18 = vsub.f32 %v735_v14, %v724_v13 }
 0x1d7   :  { %v752_v19 = vmul.f32 %v751_v18, %v750_v17 }
 0x1d8   :  { %v1141_v20 = vpop.eup %1140 }
 0x1d9   :  { %v692_v21 = vmul.f32 0.6931472, %v1141_v20  ;;  %753 = vadd.xlane.f32.xlu2 %v752_v19  ;;  %v1143_v28 = vpop.eup %1142 }
 0x1da   :  { %v1145_v29 = vpop.eup %1144  ;;  %v706_v32 = vmul.f32 8.0, %v1143_v28  ;;  %vm710_vm5 = vweird.f32 %v1143_v28 }
 0x1db   :  { %v693_v24 = vsub.f32 %v686_v54, %v692_v21  ;;  %v764_v34 = vmul.f32 1024.0, %v1145_v29  ;;  %vm768_vm6 = vweird.f32 %v1145_v29 }
 0x1dc   :  { %v707_v35 = vsub.f32 1.0, %v706_v32 }
 0x1dd   :  { %v694_v25 = vmul.f32 %v1048_v23, %v693_v24  ;;  %v765_v39 = vsub.f32 1.0, %v764_v34 }
 0x1de   :  { %v708_v41 = vmul.f32 %v1143_v28, %v707_v35 }
 0x1df   :  { %695 = vadd.xlane.f32.xlu1 %v694_v25  ;;  %v766_v44 = vmul.f32 %v1145_v29, %v765_v39 }
 0x1e0   :  { %v709_v46 = vadd.f32 %v1143_v28, %v708_v41 }
 0x1e1   :  { %v767_v49 = vadd.f32 %v1145_v29, %v766_v44 }
 0x1e2   :  { %v711_v51 = vsel %vm710_vm5, %v1143_v28, %v709_v46 }
 0x1e3   :  { %v769_v53 = vsel %vm768_vm6, %v1145_v29, %v767_v49 }
 0x24c   :  { %v754_v30 = vpop.xlane.xlu2 %753 }
 0x24d   :  { %v755_v31 = vrot.slane %v754_v30, 4 }
 0x24f   :  { %v756_v33 = vadd.f32 %v755_v31, %v754_v30 }
 0x251   :  { %v757_v37 = vrot.slane %v756_v33, 2 }
 0x252   :  { %v696_v36 = vpop.xlane.xlu1 %695 }
 0x253   :  { %v697_v38 = vrot.slane %v696_v36, 4  ;;  %v758_v42 = vadd.f32 %v757_v37, %v756_v33 }
 0x255   :  { %v698_v40 = vadd.f32 %v697_v38, %v696_v36  ;;  %v759_v48 = vrot.slane %v758_v42, 1 }
 0x257   :  { %v699_v43 = vrot.slane %v698_v40, 2  ;;  %v760_v52 = vadd.f32 %v759_v48, %v758_v42 }
 0x259   :  { %v700_v45 = vadd.f32 %v699_v43, %v698_v40 }
 0x25b   :  { %v701_v47 = vrot.slane %v700_v45, 1 }
 0x25d   :  { %v702_v50 = vadd.f32 %v701_v47, %v700_v45 }
 0x25f   :  { %1113 = vpush %v702_v50 }
 0x260   :  { %1115 = vpush %v711_v51 }
 0x261   :  { %1117 = vpush %v760_v52 }
 0x262   :  { %1119 = vpush %v769_v53 }
 0x290   :  { %s1114_s2 = spop %1113 }
 0x291   :  { %s704_s4 = ssub.f32 0.0, %s1114_s2  ;;  %s1116_s5 = spop %1115 }
 0x292   :  { %s1118_s26 = spop %1117 }
 0x293   :  { %s713_s27 = smul.f32 %s1116_s5, %s704_s4  ;;  %s1120_s28 = spop %1119 }
 0x294   :  { %s762_s29 = smul.f32 4.0, %s1118_s26 }
 0x295   :  { %s772_s30 = smul.f32 0.5, %s713_s27 }
 0x296   :  { %s771_s7 = smul.f32 %s1120_s28, %s762_s29 }
 0x298   :  { %s773_s11 = smul.f32 0.5, %s771_s7 }
 0x29a   :  { %s774_s12 = sadd.f32 %s773_s11, %s772_s30 }
 0x29c   :  { %776 = sst [smem:[#allocation3]] %s774_s12 }
 0x29d   :  { %785 = dma.smem_to_hbm %s1164_s13, 16, %s783_s10, [#allocation4]  }
 0x29e   :  { %1158 = dma.done.wait [#allocation4], 16  }
 0x29f   :  { %1159 = vsyncadd [#allocation4], 4294967280 }
 0x2a0   :  { %790 = sfence }
 0x2a1   :  { %791 = vsyncpa [#allocation4], 1 }

</bundles_post_ra>
